<compile_context>
chip_gen: v6e
topology: v6e:2x2x1
jax: 0.10.0
libtpu: 0.0.40
codegen_flags: <defaults>
</compile_context>

<pallas_src>
import math

import jax
import jax.numpy as jnp
from jax import lax
from jax.experimental import pallas as pl
from jax.experimental.pallas import tpu as pltpu


def _make_transformer_kernel(num_heads, head_dim, eps=1e-5):

    def kernel(x_ref,                     # (Bb, L, C)   input dtype
               ln1_g_ref, ln1_b_ref,      # (1, C) f32
               wqkv_ref, bqkv_ref,        # (C, 3C) bf16, (1, 3C) f32
               wo_ref, bo_ref,            # (C, C)  bf16, (1, C)  f32
               ln2_g_ref, ln2_b_ref,      # (1, C) f32
               w1_ref, w2_ref,            # (C, 4C) bf16, (4C, C) bf16
               o_ref):                    # (Bb, L, C)
        Bb, L, C = x_ref.shape
        H, d = num_heads, head_dim

        # Fold (Bb, L) into the GEMM M dimension (free leading-dim reshape).
        x = x_ref[...].astype(jnp.float32).reshape(Bb * L, C)

        def layer_norm(v, g, b):
            mu = jnp.mean(v, axis=-1, keepdims=True)
            dlt = v - mu
            var = jnp.mean(dlt * dlt, axis=-1, keepdims=True)
            return dlt * lax.rsqrt(var + eps) * g + b

        # ---------------- attention block ----------------
        x_ln = layer_norm(x, ln1_g_ref[...], ln1_b_ref[...])

        # One fused, lane-dense QKV projection (bf16 in, f32 accumulate).
        qkv = jnp.dot(x_ln.astype(jnp.bfloat16), wqkv_ref[...],
                      preferred_element_type=jnp.float32) + bqkv_ref[...]
        qkv = qkv.astype(jnp.bfloat16).reshape(Bb, L, 3 * C)

        # Per-head attention.  No concat: each head's context is contracted
        # with its d rows of the out-projection and accumulated in f32.
        # 1/sqrt(d) is already folded into the q weight/bias by the wrapper.
        # TODO(synk): for large num_heads switch to lax.fori_loop, and use a
        # flash-style online softmax over L tiles once L is realistic.
        attn = jnp.zeros((Bb * L, C), jnp.float32)
        for h in range(H):
            lo = h * d
            q_h = qkv[:, :, lo:lo + d]
            k_h = qkv[:, :, C + lo:C + lo + d]
            v_h = qkv[:, :, 2 * C + lo:2 * C + lo + d]
            s = jnp.einsum("bqd,bkd->bqk", q_h, k_h,
                           preferred_element_type=jnp.float32)
            s = s - jnp.max(s, axis=-1, keepdims=True)
            e = jnp.exp(s)
            # exact reciprocal; approx=True (EUP) is available for looser tol.
            p = e * pl.reciprocal(jnp.sum(e, axis=-1, keepdims=True),
                                  approx=False)
            ctx = jnp.einsum("bqk,bkd->bqd", p.astype(jnp.bfloat16), v_h,
                             preferred_element_type=jnp.float32)
            attn += jnp.dot(ctx.reshape(Bb * L, d).astype(jnp.bfloat16),
                            wo_ref[lo:lo + d, :],
                            preferred_element_type=jnp.float32)

        # TODO(synk): nn.Dropout(0.1) treated as identity (eval mode).
        x1 = x + attn + bo_ref[...]

        # ---------------- MLP block ----------------
        x_ln2 = layer_norm(x1, ln2_g_ref[...], ln2_b_ref[...])
        hmid = jnp.maximum(
            jnp.dot(x_ln2.astype(jnp.bfloat16), w1_ref[...],
                    preferred_element_type=jnp.float32), 0.0)
        y = jnp.dot(hmid.astype(jnp.bfloat16), w2_ref[...],
                    preferred_element_type=jnp.float32)

        o_ref[...] = (x1 + y).reshape(Bb, L, C).astype(o_ref.dtype)

    return kernel


def transformer_layer(x, params, *, num_heads, eps=1e-5):
    """x: (L, B, C) — (seq, batch, channels), matching the PyTorch module
    (nn.MultiheadAttention with batch_first=False). Returns (L, B, C)."""
    L, B, C = x.shape
    assert C % num_heads == 0
    head_dim = C // num_heads
    scale = 1.0 / math.sqrt(head_dim)

    # Fuse self.q/k/v with the MHA in-projection (x @ Wq.T @ Wq_in.T ==
    # x @ (Wq_in @ Wq).T), fold the 1/sqrt(head_dim) scale into the q part
    # (weight AND bias), pre-transpose, and keep matmul weights in bf16
    # (MXU-native rate; halves VMEM residency — matters on v7x's 64 MiB).
    wq_in, wk_in, wv_in = jnp.split(params["in_proj_w"], 3, axis=0)
    w_q = (wq_in @ params["q_w"]).T * scale                 # (C, C)
    w_k = (wk_in @ params["k_w"]).T
    w_v = (wv_in @ params["v_w"]).T
    w_qkv = jnp.concatenate([w_q, w_k, w_v], axis=1).astype(jnp.bfloat16)
    bq, bk, bv = jnp.split(params["in_proj_b"], 3)
    b_qkv = jnp.concatenate([bq * scale, bk, bv]).reshape(1, 3 * C)
    b_qkv = b_qkv.astype(jnp.float32)

    w_out = params["out_proj_w"].T.astype(jnp.bfloat16)     # (C, C)
    b_out = params["out_proj_b"].reshape(1, C).astype(jnp.float32)
    w1 = params["fc1_w"].T.astype(jnp.bfloat16)             # (C, 4C)
    w2 = params["fc2_w"].T.astype(jnp.bfloat16)             # (4C, C)

    ln1_g = params["ln1_g"].reshape(1, C).astype(jnp.float32)
    ln1_b = params["ln1_b"].reshape(1, C).astype(jnp.float32)
    ln2_g = params["ln2_g"].reshape(1, C).astype(jnp.float32)
    ln2_b = params["ln2_b"].reshape(1, C).astype(jnp.float32)

    # Pack as many sequences per grid step as keeps the GEMM M dim ~<=256
    # rows; for the test config (B=2, L=8) this is a single grid step.
    bb = 1
    for cand in range(1, B + 1):
        if B % cand == 0 and cand * L <= 256:
            bb = cand
    grid = (B // bb,)

    # Kernel works in (B, L, C); batch-block axis is the (parallel) grid.
    # TODO(synk): the (L,B,C)->(B,L,C) transpose costs one extra HBM pass; it
    # could be folded into the BlockSpec index_map for memory-bound sizes.
    x_blc = jnp.transpose(x, (1, 0, 2))

    def rep(shape):
        return pl.BlockSpec(shape, lambda b: (0,) * len(shape))

    # Explicit VMEM budget: bf16 weights (double-buffered) + f32 activations
    # + I/O blocks, with headroom; clamped to v7x's 64 MiB per-core VMEM.
    weight_bytes = 2 * 2 * (w_qkv.size + w_out.size + w1.size + w2.size)
    act_bytes = 4 * (bb * L) * (3 * C + 4 * C + 6 * C)
    io_bytes = 2 * 2 * (bb * L * C) * x.dtype.itemsize
    vmem_limit = int(min(4 * (weight_bytes + act_bytes + io_bytes) + (1 << 20),
                         64 * 1024 * 1024))

    out = pl.pallas_call(
        _make_transformer_kernel(num_heads, head_dim, eps),
        out_shape=jax.ShapeDtypeStruct((B, L, C), x.dtype),
        grid_spec=pltpu.PrefetchScalarGridSpec(
            num_scalar_prefetch=0,
            grid=grid,
            in_specs=[
                pl.BlockSpec((bb, L, C), lambda b: (b, 0, 0)),   # x
                rep((1, C)), rep((1, C)),                        # ln1
                rep((C, 3 * C)), rep((1, 3 * C)),                # fused qkv
                rep((C, C)), rep((1, C)),                        # out_proj
                rep((1, C)), rep((1, C)),                        # ln2
                rep((C, 4 * C)), rep((4 * C, C)),                # mlp
            ],
            out_specs=pl.BlockSpec((bb, L, C), lambda b: (b, 0, 0)),
        ),
        compiler_params=pltpu.CompilerParams(
            dimension_semantics=("parallel",),
            vmem_limit_bytes=vmem_limit),
    )(x_blc, ln1_g, ln1_b, w_qkv, b_qkv, w_out, b_out,
      ln2_g, ln2_b, w1, w2)

    return jnp.transpose(out, (1, 0, 2))


def init_params(key, c):
    """Deterministic synthetic init mirroring the module's parameter shapes
    (nn.Linear layout: weight is (out_features, in_features))."""
    ks = jax.random.split(key, 10)

    def lin(k, out_f, in_f):
        bound = 1.0 / math.sqrt(in_f)
        return jax.random.uniform(k, (out_f, in_f), jnp.float32, -bound, bound)

    def bias(k, n, fan_in):
        bound = 1.0 / math.sqrt(fan_in)
        return jax.random.uniform(k, (n,), jnp.float32, -bound, bound)

    return {
        "ln1_g": jnp.ones((c,), jnp.float32),
        "ln1_b": jnp.zeros((c,), jnp.float32),
        "q_w": lin(ks[0], c, c),
        "k_w": lin(ks[1], c, c),
        "v_w": lin(ks[2], c, c),
        "in_proj_w": lin(ks[3], 3 * c, c),
        "in_proj_b": bias(ks[4], 3 * c, c),
        "out_proj_w": lin(ks[5], c, c),
        "out_proj_b": bias(ks[6], c, c),
        "ln2_g": jnp.ones((c,), jnp.float32),
        "ln2_b": jnp.zeros((c,), jnp.float32),
        "fc1_w": lin(ks[7], 4 * c, c),
        "fc2_w": lin(ks[8], c, 4 * c),
    }


def reference(x, params, *, num_heads, eps=1e-5):
    """Pure-JAX f32 reference mirroring the PyTorch module in eval mode."""
    L, B, C = x.shape
    dh = C // num_heads

    def ln(v, g, b):
        mu = jnp.mean(v, axis=-1, keepdims=True)
        var = jnp.mean((v - mu) ** 2, axis=-1, keepdims=True)
        return (v - mu) / jnp.sqrt(var + eps) * g + b

    x_ = ln(x, params["ln1_g"], params["ln1_b"])
    q = x_ @ params["q_w"].T
    k = x_ @ params["k_w"].T
    v = x_ @ params["v_w"].T
    wq_in, wk_in, wv_in = jnp.split(params["in_proj_w"], 3, axis=0)
    bq, bk, bv = jnp.split(params["in_proj_b"], 3)
    q = (q @ wq_in.T + bq).reshape(L, B, num_heads, dh)
    k = (k @ wk_in.T + bk).reshape(L, B, num_heads, dh)
    v = (v @ wv_in.T + bv).reshape(L, B, num_heads, dh)
    s = jnp.einsum("lbhd,mbhd->bhlm", q, k) / math.sqrt(dh)
    p = jax.nn.softmax(s, axis=-1)
    o = jnp.einsum("bhlm,mbhd->lbhd", p, v).reshape(L, B, C)
    o = o @ params["out_proj_w"].T + params["out_proj_b"]
    x1 = x + o
    x2 = ln(x1, params["ln2_g"], params["ln2_b"])
    y = jax.nn.relu(x2 @ params["fc1_w"].T) @ params["fc2_w"].T
    return x1 + y


if __name__ == "__main__":
    key = jax.random.PRNGKey(0)
    kx, kp = jax.random.split(key)

    L, B, C, H = 8, 2, 32, 4   # (seq, batch, channels, heads)
    x = jax.random.normal(kx, (L, B, C), dtype=jnp.float32)
    params = init_params(kp, C)

    out = transformer_layer(x, params, num_heads=H)
    out = jax.block_until_ready(out)

    assert out.shape == (L, B, C)
    assert bool(jnp.all(jnp.isfinite(out)))

    ref = reference(x, params, num_heads=H)
    max_err = float(jnp.max(jnp.abs(out - ref)))
    assert jnp.allclose(out, ref, rtol=2e-2, atol=2e-2), max_err

    print("KERNEL_OK")
</pallas_src>

<mosaic_0001>
module attributes {stable_mosaic.version = 11 : i64} {
  func.func @kernel(%arg0: i32, %arg1: memref<2x8x32xf32, #tpu.memory_space<vmem>>, %arg2: memref<1x32xf32, #tpu.memory_space<vmem>>, %arg3: memref<1x32xf32, #tpu.memory_space<vmem>>, %arg4: memref<32x96xbf16, #tpu.memory_space<vmem>>, %arg5: memref<1x96xf32, #tpu.memory_space<vmem>>, %arg6: memref<32x32xbf16, #tpu.memory_space<vmem>>, %arg7: memref<1x32xf32, #tpu.memory_space<vmem>>, %arg8: memref<1x32xf32, #tpu.memory_space<vmem>>, %arg9: memref<1x32xf32, #tpu.memory_space<vmem>>, %arg10: memref<32x128xbf16, #tpu.memory_space<vmem>>, %arg11: memref<128x32xbf16, #tpu.memory_space<vmem>>, %arg12: memref<2x8x32xf32, #tpu.memory_space<vmem>>) attributes {dimension_semantics = [#tpu.dimension_semantics<parallel>], iteration_bounds = array<i64: 1>, scalar_prefetch = 0 : i64, scratch_operands = 0 : i64, tpu.core_type = #tpu.core_type<tc>, window_params = [{transform_indices = @transform_0, window_bounds = array<i64: 2, 8, 32>}, {pipeline_mode = #tpu.pipeline_mode<synchronous>, transform_indices = @transform_1, window_bounds = array<i64: 1, 32>}, {pipeline_mode = #tpu.pipeline_mode<synchronous>, transform_indices = @transform_2, window_bounds = array<i64: 1, 32>}, {pipeline_mode = #tpu.pipeline_mode<synchronous>, transform_indices = @transform_3, window_bounds = array<i64: 32, 96>}, {pipeline_mode = #tpu.pipeline_mode<synchronous>, transform_indices = @transform_4, window_bounds = array<i64: 1, 96>}, {pipeline_mode = #tpu.pipeline_mode<synchronous>, transform_indices = @transform_5, window_bounds = array<i64: 32, 32>}, {pipeline_mode = #tpu.pipeline_mode<synchronous>, transform_indices = @transform_6, window_bounds = array<i64: 1, 32>}, {pipeline_mode = #tpu.pipeline_mode<synchronous>, transform_indices = @transform_7, window_bounds = array<i64: 1, 32>}, {pipeline_mode = #tpu.pipeline_mode<synchronous>, transform_indices = @transform_8, window_bounds = array<i64: 1, 32>}, {pipeline_mode = #tpu.pipeline_mode<synchronous>, transform_indices = @transform_9, window_bounds = array<i64: 32, 128>}, {pipeline_mode = #tpu.pipeline_mode<synchronous>, transform_indices = @transform_10, window_bounds = array<i64: 128, 32>}, {transform_indices = @transform_11, window_bounds = array<i64: 2, 8, 32>}]} {
    %c0 = arith.constant 0 : index
    %c0_0 = arith.constant 0 : index
    %c0_1 = arith.constant 0 : index
    %0 = vector.load %arg1[%c0, %c0_0, %c0_1] : memref<2x8x32xf32, #tpu.memory_space<vmem>>, vector<2x8x32xf32>
    %1 = vector.shape_cast %0 : vector<2x8x32xf32> to vector<16x32xf32>
    %c0_2 = arith.constant 0 : index
    %c0_3 = arith.constant 0 : index
    %2 = vector.load %arg2[%c0_2, %c0_3] : memref<1x32xf32, #tpu.memory_space<vmem>>, vector<1x32xf32>
    %c0_4 = arith.constant 0 : index
    %c0_5 = arith.constant 0 : index
    %3 = vector.load %arg3[%c0_4, %c0_5] : memref<1x32xf32, #tpu.memory_space<vmem>>, vector<1x32xf32>
    %cst = arith.constant dense<0.000000e+00> : vector<16xf32>
    %4 = vector.multi_reduction <add>, %1, %cst [1] : vector<16x32xf32> to vector<16xf32>
    %5 = vector.shape_cast %4 : vector<16xf32> to vector<16x1xf32>
    %cst_6 = arith.constant 3.200000e+01 : f32
    %6 = vector.broadcast %cst_6 : f32 to vector<16x1xf32>
    %7 = arith.divf %5, %6 : vector<16x1xf32>
    %8 = vector.broadcast %7 : vector<16x1xf32> to vector<16x32xf32>
    %9 = arith.subf %1, %8 : vector<16x32xf32>
    %10 = arith.mulf %9, %9 : vector<16x32xf32>
    %cst_7 = arith.constant dense<0.000000e+00> : vector<16xf32>
    %11 = vector.multi_reduction <add>, %10, %cst_7 [1] : vector<16x32xf32> to vector<16xf32>
    %12 = vector.shape_cast %11 : vector<16xf32> to vector<16x1xf32>
    %cst_8 = arith.constant 3.200000e+01 : f32
    %13 = vector.broadcast %cst_8 : f32 to vector<16x1xf32>
    %14 = arith.divf %12, %13 : vector<16x1xf32>
    %cst_9 = arith.constant 9.99999974E-6 : f32
    %15 = vector.broadcast %cst_9 : f32 to vector<16x1xf32>
    %16 = arith.addf %14, %15 : vector<16x1xf32>
    %17 = math.rsqrt %16 : vector<16x1xf32>
    %18 = vector.broadcast %17 : vector<16x1xf32> to vector<16x32xf32>
    %19 = arith.mulf %9, %18 : vector<16x32xf32>
    %20 = vector.broadcast %2 : vector<1x32xf32> to vector<16x32xf32>
    %21 = arith.mulf %19, %20 : vector<16x32xf32>
    %22 = vector.broadcast %3 : vector<1x32xf32> to vector<16x32xf32>
    %23 = arith.addf %21, %22 : vector<16x32xf32>
    %24 = arith.truncf %23 : vector<16x32xf32> to vector<16x32xbf16>
    %c0_10 = arith.constant 0 : index
    %c0_11 = arith.constant 0 : index
    %25 = vector.load %arg4[%c0_10, %c0_11] : memref<32x96xbf16, #tpu.memory_space<vmem>>, vector<32x96xbf16>
    %cst_12 = arith.constant dense<0.000000e+00> : vector<16x96xf32>
    %26 = tpu.matmul %24, %25, %cst_12 {dimension_numbers = #tpu.dot_dimension_numbers<[1], [0], [0], [1], [0, 0, 1, 1], [], []>} : vector<16x32xbf16>, vector<32x96xbf16>, vector<16x96xf32> -> vector<16x96xf32>
    %c0_13 = arith.constant 0 : index
    %c0_14 = arith.constant 0 : index
    %27 = vector.load %arg5[%c0_13, %c0_14] : memref<1x96xf32, #tpu.memory_space<vmem>>, vector<1x96xf32>
    %28 = vector.broadcast %27 : vector<1x96xf32> to vector<16x96xf32>
    %29 = arith.addf %26, %28 : vector<16x96xf32>
    %30 = arith.truncf %29 : vector<16x96xf32> to vector<16x96xbf16>
    %31 = vector.shape_cast %30 : vector<16x96xbf16> to vector<2x8x96xbf16>
    %cst_15 = arith.constant 0.000000e+00 : f32
    %32 = vector.broadcast %cst_15 : f32 to vector<16x32xf32>
    %33 = vector.extract_strided_slice %31 {offsets = [0, 0, 0], sizes = [2, 8, 8], strides = [1, 1, 1]} : vector<2x8x96xbf16> to vector<2x8x8xbf16>
    %34 = vector.extract_strided_slice %31 {offsets = [0, 0, 32], sizes = [2, 8, 8], strides = [1, 1, 1]} : vector<2x8x96xbf16> to vector<2x8x8xbf16>
    %35 = vector.extract_strided_slice %31 {offsets = [0, 0, 64], sizes = [2, 8, 8], strides = [1, 1, 1]} : vector<2x8x96xbf16> to vector<2x8x8xbf16>
    "tpu.trace_start"() <{level = 10 : i32, message = "bqd,bkd->bqk"}> : () -> ()
    %cst_16 = arith.constant dense<0.000000e+00> : vector<2x8x8xf32>
    %36 = tpu.matmul %33, %34, %cst_16 {dimension_numbers = #tpu.dot_dimension_numbers<[2], [2], [1], [1], [0, 0, 0, 1, 1, 1], [0], [0]>} : vector<2x8x8xbf16>, vector<2x8x8xbf16>, vector<2x8x8xf32> -> vector<2x8x8xf32>
    "tpu.trace_stop"() : () -> ()
    %cst_17 = arith.constant dense<0xFF800000> : vector<2x8xf32>
    %37 = vector.multi_reduction <maximumf>, %36, %cst_17 [2] : vector<2x8x8xf32> to vector<2x8xf32>
    %38 = vector.shape_cast %37 : vector<2x8xf32> to vector<2x8x1xf32>
    %39 = vector.broadcast %38 : vector<2x8x1xf32> to vector<2x8x8xf32>
    %40 = arith.subf %36, %39 : vector<2x8x8xf32>
    %41 = math.exp %40 : vector<2x8x8xf32>
    %cst_18 = arith.constant dense<0.000000e+00> : vector<2x8xf32>
    %42 = vector.multi_reduction <add>, %41, %cst_18 [2] : vector<2x8x8xf32> to vector<2x8xf32>
    %43 = vector.shape_cast %42 : vector<2x8xf32> to vector<2x8x1xf32>
    %44 = tpu.reciprocal %43 : vector<2x8x1xf32> -> vector<2x8x1xf32>
    %45 = vector.broadcast %44 : vector<2x8x1xf32> to vector<2x8x8xf32>
    %46 = arith.mulf %41, %45 : vector<2x8x8xf32>
    %47 = arith.truncf %46 : vector<2x8x8xf32> to vector<2x8x8xbf16>
    "tpu.trace_start"() <{level = 10 : i32, message = "bqk,bkd->bqd"}> : () -> ()
    %cst_19 = arith.constant dense<0.000000e+00> : vector<2x8x8xf32>
    %48 = tpu.matmul %47, %35, %cst_19 {dimension_numbers = #tpu.dot_dimension_numbers<[2], [1], [1], [2], [0, 0, 0, 1, 1, 2], [0], [0]>} : vector<2x8x8xbf16>, vector<2x8x8xbf16>, vector<2x8x8xf32> -> vector<2x8x8xf32>
    "tpu.trace_stop"() : () -> ()
    %49 = vector.shape_cast %48 : vector<2x8x8xf32> to vector<16x8xf32>
    %50 = arith.truncf %49 : vector<16x8xf32> to vector<16x8xbf16>
    %c0_20 = arith.constant 0 : index
    %c0_21 = arith.constant 0 : index
    %51 = vector.load %arg6[%c0_20, %c0_21] : memref<32x32xbf16, #tpu.memory_space<vmem>>, vector<8x32xbf16>
    %cst_22 = arith.constant dense<0.000000e+00> : vector<16x32xf32>
    %52 = tpu.matmul %50, %51, %cst_22 {dimension_numbers = #tpu.dot_dimension_numbers<[1], [0], [0], [1], [0, 0, 1, 1], [], []>} : vector<16x8xbf16>, vector<8x32xbf16>, vector<16x32xf32> -> vector<16x32xf32>
    %53 = arith.addf %32, %52 : vector<16x32xf32>
    %54 = vector.extract_strided_slice %31 {offsets = [0, 0, 8], sizes = [2, 8, 8], strides = [1, 1, 1]} : vector<2x8x96xbf16> to vector<2x8x8xbf16>
    %55 = vector.extract_strided_slice %31 {offsets = [0, 0, 40], sizes = [2, 8, 8], strides = [1, 1, 1]} : vector<2x8x96xbf16> to vector<2x8x8xbf16>
    %56 = vector.extract_strided_slice %31 {offsets = [0, 0, 72], sizes = [2, 8, 8], strides = [1, 1, 1]} : vector<2x8x96xbf16> to vector<2x8x8xbf16>
    "tpu.trace_start"() <{level = 10 : i32, message = "bqd,bkd->bqk"}> : () -> ()
    %cst_23 = arith.constant dense<0.000000e+00> : vector<2x8x8xf32>
    %57 = tpu.matmul %54, %55, %cst_23 {dimension_numbers = #tpu.dot_dimension_numbers<[2], [2], [1], [1], [0, 0, 0, 1, 1, 1], [0], [0]>} : vector<2x8x8xbf16>, vector<2x8x8xbf16>, vector<2x8x8xf32> -> vector<2x8x8xf32>
    "tpu.trace_stop"() : () -> ()
    %cst_24 = arith.constant dense<0xFF800000> : vector<2x8xf32>
    %58 = vector.multi_reduction <maximumf>, %57, %cst_24 [2] : vector<2x8x8xf32> to vector<2x8xf32>
    %59 = vector.shape_cast %58 : vector<2x8xf32> to vector<2x8x1xf32>
    %60 = vector.broadcast %59 : vector<2x8x1xf32> to vector<2x8x8xf32>
    %61 = arith.subf %57, %60 : vector<2x8x8xf32>
    %62 = math.exp %61 : vector<2x8x8xf32>
    %cst_25 = arith.constant dense<0.000000e+00> : vector<2x8xf32>
    %63 = vector.multi_reduction <add>, %62, %cst_25 [2] : vector<2x8x8xf32> to vector<2x8xf32>
    %64 = vector.shape_cast %63 : vector<2x8xf32> to vector<2x8x1xf32>
    %65 = tpu.reciprocal %64 : vector<2x8x1xf32> -> vector<2x8x1xf32>
    %66 = vector.broadcast %65 : vector<2x8x1xf32> to vector<2x8x8xf32>
    %67 = arith.mulf %62, %66 : vector<2x8x8xf32>
    %68 = arith.truncf %67 : vector<2x8x8xf32> to vector<2x8x8xbf16>
    "tpu.trace_start"() <{level = 10 : i32, message = "bqk,bkd->bqd"}> : () -> ()
    %cst_26 = arith.constant dense<0.000000e+00> : vector<2x8x8xf32>
    %69 = tpu.matmul %68, %56, %cst_26 {dimension_numbers = #tpu.dot_dimension_numbers<[2], [1], [1], [2], [0, 0, 0, 1, 1, 2], [0], [0]>} : vector<2x8x8xbf16>, vector<2x8x8xbf16>, vector<2x8x8xf32> -> vector<2x8x8xf32>
    "tpu.trace_stop"() : () -> ()
    %70 = vector.shape_cast %69 : vector<2x8x8xf32> to vector<16x8xf32>
    %71 = arith.truncf %70 : vector<16x8xf32> to vector<16x8xbf16>
    %c8 = arith.constant 8 : index
    %c0_27 = arith.constant 0 : index
    %72 = vector.load %arg6[%c8, %c0_27] : memref<32x32xbf16, #tpu.memory_space<vmem>>, vector<8x32xbf16>
    %cst_28 = arith.constant dense<0.000000e+00> : vector<16x32xf32>
    %73 = tpu.matmul %71, %72, %cst_28 {dimension_numbers = #tpu.dot_dimension_numbers<[1], [0], [0], [1], [0, 0, 1, 1], [], []>} : vector<16x8xbf16>, vector<8x32xbf16>, vector<16x32xf32> -> vector<16x32xf32>
    %74 = arith.addf %53, %73 : vector<16x32xf32>
    %75 = vector.extract_strided_slice %31 {offsets = [0, 0, 16], sizes = [2, 8, 8], strides = [1, 1, 1]} : vector<2x8x96xbf16> to vector<2x8x8xbf16>
    %76 = vector.extract_strided_slice %31 {offsets = [0, 0, 48], sizes = [2, 8, 8], strides = [1, 1, 1]} : vector<2x8x96xbf16> to vector<2x8x8xbf16>
    %77 = vector.extract_strided_slice %31 {offsets = [0, 0, 80], sizes = [2, 8, 8], strides = [1, 1, 1]} : vector<2x8x96xbf16> to vector<2x8x8xbf16>
    "tpu.trace_start"() <{level = 10 : i32, message = "bqd,bkd->bqk"}> : () -> ()
    %cst_29 = arith.constant dense<0.000000e+00> : vector<2x8x8xf32>
    %78 = tpu.matmul %75, %76, %cst_29 {dimension_numbers = #tpu.dot_dimension_numbers<[2], [2], [1], [1], [0, 0, 0, 1, 1, 1], [0], [0]>} : vector<2x8x8xbf16>, vector<2x8x8xbf16>, vector<2x8x8xf32> -> vector<2x8x8xf32>
    "tpu.trace_stop"() : () -> ()
    %cst_30 = arith.constant dense<0xFF800000> : vector<2x8xf32>
    %79 = vector.multi_reduction <maximumf>, %78, %cst_30 [2] : vector<2x8x8xf32> to vector<2x8xf32>
    %80 = vector.shape_cast %79 : vector<2x8xf32> to vector<2x8x1xf32>
    %81 = vector.broadcast %80 : vector<2x8x1xf32> to vector<2x8x8xf32>
    %82 = arith.subf %78, %81 : vector<2x8x8xf32>
    %83 = math.exp %82 : vector<2x8x8xf32>
    %cst_31 = arith.constant dense<0.000000e+00> : vector<2x8xf32>
    %84 = vector.multi_reduction <add>, %83, %cst_31 [2] : vector<2x8x8xf32> to vector<2x8xf32>
    %85 = vector.shape_cast %84 : vector<2x8xf32> to vector<2x8x1xf32>
    %86 = tpu.reciprocal %85 : vector<2x8x1xf32> -> vector<2x8x1xf32>
    %87 = vector.broadcast %86 : vector<2x8x1xf32> to vector<2x8x8xf32>
    %88 = arith.mulf %83, %87 : vector<2x8x8xf32>
    %89 = arith.truncf %88 : vector<2x8x8xf32> to vector<2x8x8xbf16>
    "tpu.trace_start"() <{level = 10 : i32, message = "bqk,bkd->bqd"}> : () -> ()
    %cst_32 = arith.constant dense<0.000000e+00> : vector<2x8x8xf32>
    %90 = tpu.matmul %89, %77, %cst_32 {dimension_numbers = #tpu.dot_dimension_numbers<[2], [1], [1], [2], [0, 0, 0, 1, 1, 2], [0], [0]>} : vector<2x8x8xbf16>, vector<2x8x8xbf16>, vector<2x8x8xf32> -> vector<2x8x8xf32>
    "tpu.trace_stop"() : () -> ()
    %91 = vector.shape_cast %90 : vector<2x8x8xf32> to vector<16x8xf32>
    %92 = arith.truncf %91 : vector<16x8xf32> to vector<16x8xbf16>
    %c16 = arith.constant 16 : index
    %c0_33 = arith.constant 0 : index
    %93 = vector.load %arg6[%c16, %c0_33] : memref<32x32xbf16, #tpu.memory_space<vmem>>, vector<8x32xbf16>
    %cst_34 = arith.constant dense<0.000000e+00> : vector<16x32xf32>
    %94 = tpu.matmul %92, %93, %cst_34 {dimension_numbers = #tpu.dot_dimension_numbers<[1], [0], [0], [1], [0, 0, 1, 1], [], []>} : vector<16x8xbf16>, vector<8x32xbf16>, vector<16x32xf32> -> vector<16x32xf32>
    %95 = arith.addf %74, %94 : vector<16x32xf32>
    %96 = vector.extract_strided_slice %31 {offsets = [0, 0, 24], sizes = [2, 8, 8], strides = [1, 1, 1]} : vector<2x8x96xbf16> to vector<2x8x8xbf16>
    %97 = vector.extract_strided_slice %31 {offsets = [0, 0, 56], sizes = [2, 8, 8], strides = [1, 1, 1]} : vector<2x8x96xbf16> to vector<2x8x8xbf16>
    %98 = vector.extract_strided_slice %31 {offsets = [0, 0, 88], sizes = [2, 8, 8], strides = [1, 1, 1]} : vector<2x8x96xbf16> to vector<2x8x8xbf16>
    "tpu.trace_start"() <{level = 10 : i32, message = "bqd,bkd->bqk"}> : () -> ()
    %cst_35 = arith.constant dense<0.000000e+00> : vector<2x8x8xf32>
    %99 = tpu.matmul %96, %97, %cst_35 {dimension_numbers = #tpu.dot_dimension_numbers<[2], [2], [1], [1], [0, 0, 0, 1, 1, 1], [0], [0]>} : vector<2x8x8xbf16>, vector<2x8x8xbf16>, vector<2x8x8xf32> -> vector<2x8x8xf32>
    "tpu.trace_stop"() : () -> ()
    %cst_36 = arith.constant dense<0xFF800000> : vector<2x8xf32>
    %100 = vector.multi_reduction <maximumf>, %99, %cst_36 [2] : vector<2x8x8xf32> to vector<2x8xf32>
    %101 = vector.shape_cast %100 : vector<2x8xf32> to vector<2x8x1xf32>
    %102 = vector.broadcast %101 : vector<2x8x1xf32> to vector<2x8x8xf32>
    %103 = arith.subf %99, %102 : vector<2x8x8xf32>
    %104 = math.exp %103 : vector<2x8x8xf32>
    %cst_37 = arith.constant dense<0.000000e+00> : vector<2x8xf32>
    %105 = vector.multi_reduction <add>, %104, %cst_37 [2] : vector<2x8x8xf32> to vector<2x8xf32>
    %106 = vector.shape_cast %105 : vector<2x8xf32> to vector<2x8x1xf32>
    %107 = tpu.reciprocal %106 : vector<2x8x1xf32> -> vector<2x8x1xf32>
    %108 = vector.broadcast %107 : vector<2x8x1xf32> to vector<2x8x8xf32>
    %109 = arith.mulf %104, %108 : vector<2x8x8xf32>
    %110 = arith.truncf %109 : vector<2x8x8xf32> to vector<2x8x8xbf16>
    "tpu.trace_start"() <{level = 10 : i32, message = "bqk,bkd->bqd"}> : () -> ()
    %cst_38 = arith.constant dense<0.000000e+00> : vector<2x8x8xf32>
    %111 = tpu.matmul %110, %98, %cst_38 {dimension_numbers = #tpu.dot_dimension_numbers<[2], [1], [1], [2], [0, 0, 0, 1, 1, 2], [0], [0]>} : vector<2x8x8xbf16>, vector<2x8x8xbf16>, vector<2x8x8xf32> -> vector<2x8x8xf32>
    "tpu.trace_stop"() : () -> ()
    %112 = vector.shape_cast %111 : vector<2x8x8xf32> to vector<16x8xf32>
    %113 = arith.truncf %112 : vector<16x8xf32> to vector<16x8xbf16>
    %c24 = arith.constant 24 : index
    %c0_39 = arith.constant 0 : index
    %114 = vector.load %arg6[%c24, %c0_39] : memref<32x32xbf16, #tpu.memory_space<vmem>>, vector<8x32xbf16>
    %cst_40 = arith.constant dense<0.000000e+00> : vector<16x32xf32>
    %115 = tpu.matmul %113, %114, %cst_40 {dimension_numbers = #tpu.dot_dimension_numbers<[1], [0], [0], [1], [0, 0, 1, 1], [], []>} : vector<16x8xbf16>, vector<8x32xbf16>, vector<16x32xf32> -> vector<16x32xf32>
    %116 = arith.addf %95, %115 : vector<16x32xf32>
    %117 = arith.addf %1, %116 : vector<16x32xf32>
    %c0_41 = arith.constant 0 : index
    %c0_42 = arith.constant 0 : index
    %118 = vector.load %arg7[%c0_41, %c0_42] : memref<1x32xf32, #tpu.memory_space<vmem>>, vector<1x32xf32>
    %119 = vector.broadcast %118 : vector<1x32xf32> to vector<16x32xf32>
    %120 = arith.addf %117, %119 : vector<16x32xf32>
    %c0_43 = arith.constant 0 : index
    %c0_44 = arith.constant 0 : index
    %121 = vector.load %arg8[%c0_43, %c0_44] : memref<1x32xf32, #tpu.memory_space<vmem>>, vector<1x32xf32>
    %c0_45 = arith.constant 0 : index
    %c0_46 = arith.constant 0 : index
    %122 = vector.load %arg9[%c0_45, %c0_46] : memref<1x32xf32, #tpu.memory_space<vmem>>, vector<1x32xf32>
    %cst_47 = arith.constant dense<0.000000e+00> : vector<16xf32>
    %123 = vector.multi_reduction <add>, %120, %cst_47 [1] : vector<16x32xf32> to vector<16xf32>
    %124 = vector.shape_cast %123 : vector<16xf32> to vector<16x1xf32>
    %cst_48 = arith.constant 3.200000e+01 : f32
    %125 = vector.broadcast %cst_48 : f32 to vector<16x1xf32>
    %126 = arith.divf %124, %125 : vector<16x1xf32>
    %127 = vector.broadcast %126 : vector<16x1xf32> to vector<16x32xf32>
    %128 = arith.subf %120, %127 : vector<16x32xf32>
    %129 = arith.mulf %128, %128 : vector<16x32xf32>
    %cst_49 = arith.constant dense<0.000000e+00> : vector<16xf32>
    %130 = vector.multi_reduction <add>, %129, %cst_49 [1] : vector<16x32xf32> to vector<16xf32>
    %131 = vector.shape_cast %130 : vector<16xf32> to vector<16x1xf32>
    %cst_50 = arith.constant 3.200000e+01 : f32
    %132 = vector.broadcast %cst_50 : f32 to vector<16x1xf32>
    %133 = arith.divf %131, %132 : vector<16x1xf32>
    %cst_51 = arith.constant 9.99999974E-6 : f32
    %134 = vector.broadcast %cst_51 : f32 to vector<16x1xf32>
    %135 = arith.addf %133, %134 : vector<16x1xf32>
    %136 = math.rsqrt %135 : vector<16x1xf32>
    %137 = vector.broadcast %136 : vector<16x1xf32> to vector<16x32xf32>
    %138 = arith.mulf %128, %137 : vector<16x32xf32>
    %139 = vector.broadcast %121 : vector<1x32xf32> to vector<16x32xf32>
    %140 = arith.mulf %138, %139 : vector<16x32xf32>
    %141 = vector.broadcast %122 : vector<1x32xf32> to vector<16x32xf32>
    %142 = arith.addf %140, %141 : vector<16x32xf32>
    %143 = arith.truncf %142 : vector<16x32xf32> to vector<16x32xbf16>
    %c0_52 = arith.constant 0 : index
    %c0_53 = arith.constant 0 : index
    %144 = vector.load %arg10[%c0_52, %c0_53] : memref<32x128xbf16, #tpu.memory_space<vmem>>, vector<32x128xbf16>
    %cst_54 = arith.constant dense<0.000000e+00> : vector<16x128xf32>
    %145 = tpu.matmul %143, %144, %cst_54 {dimension_numbers = #tpu.dot_dimension_numbers<[1], [0], [0], [1], [0, 0, 1, 1], [], []>} : vector<16x32xbf16>, vector<32x128xbf16>, vector<16x128xf32> -> vector<16x128xf32>
    %cst_55 = arith.constant 0.000000e+00 : f32
    %146 = vector.broadcast %cst_55 : f32 to vector<16x128xf32>
    %147 = arith.maximumf %145, %146 : vector<16x128xf32>
    %148 = arith.truncf %147 : vector<16x128xf32> to vector<16x128xbf16>
    %c0_56 = arith.constant 0 : index
    %c0_57 = arith.constant 0 : index
    %149 = vector.load %arg11[%c0_56, %c0_57] : memref<128x32xbf16, #tpu.memory_space<vmem>>, vector<128x32xbf16>
    %cst_58 = arith.constant dense<0.000000e+00> : vector<16x32xf32>
    %150 = tpu.matmul %148, %149, %cst_58 {dimension_numbers = #tpu.dot_dimension_numbers<[1], [0], [0], [1], [0, 0, 1, 1], [], []>} : vector<16x128xbf16>, vector<128x32xbf16>, vector<16x32xf32> -> vector<16x32xf32>
    %151 = arith.addf %120, %150 : vector<16x32xf32>
    %152 = vector.shape_cast %151 : vector<16x32xf32> to vector<2x8x32xf32>
    %c0_59 = arith.constant 0 : index
    %c0_60 = arith.constant 0 : index
    %c0_61 = arith.constant 0 : index
    %153 = vector.load %arg12[%c0_59, %c0_60, %c0_61] : memref<2x8x32xf32, #tpu.memory_space<vmem>>, vector<2x8x32xf32>
    tpu.vector_store %arg12[%c0_59, %c0_60, %c0_61], %152 {strides = array<i32>} : memref<2x8x32xf32, #tpu.memory_space<vmem>>, vector<2x8x32xf32>,
    return
  }
  func.func @transform_0(%arg0: i32) -> (i32, i32, i32) {
    %c0_i32 = arith.constant 0 : i32
    %c0_i32_0 = arith.constant 0 : i32
    %c0_i32_1 = arith.constant 0 : i32
    return %arg0, %c0_i32, %c0_i32_0 : i32, i32, i32
  }
  func.func @transform_1(%arg0: i32) -> (i32, i32) {
    %c0_i32 = arith.constant 0 : i32
    %c0_i32_0 = arith.constant 0 : i32
    %c0_i32_1 = arith.constant 0 : i32
    return %c0_i32, %c0_i32_0 : i32, i32
  }
  func.func @transform_2(%arg0: i32) -> (i32, i32) {
    %c0_i32 = arith.constant 0 : i32
    %c0_i32_0 = arith.constant 0 : i32
    %c0_i32_1 = arith.constant 0 : i32
    return %c0_i32, %c0_i32_0 : i32, i32
  }
  func.func @transform_3(%arg0: i32) -> (i32, i32) {
    %c0_i32 = arith.constant 0 : i32
    %c0_i32_0 = arith.constant 0 : i32
    %c0_i32_1 = arith.constant 0 : i32
    return %c0_i32, %c0_i32_0 : i32, i32
  }
  func.func @transform_4(%arg0: i32) -> (i32, i32) {
    %c0_i32 = arith.constant 0 : i32
    %c0_i32_0 = arith.constant 0 : i32
    %c0_i32_1 = arith.constant 0 : i32
    return %c0_i32, %c0_i32_0 : i32, i32
  }
  func.func @transform_5(%arg0: i32) -> (i32, i32) {
    %c0_i32 = arith.constant 0 : i32
    %c0_i32_0 = arith.constant 0 : i32
    %c0_i32_1 = arith.constant 0 : i32
    return %c0_i32, %c0_i32_0 : i32, i32
  }
  func.func @transform_6(%arg0: i32) -> (i32, i32) {
    %c0_i32 = arith.constant 0 : i32
    %c0_i32_0 = arith.constant 0 : i32
    %c0_i32_1 = arith.constant 0 : i32
    return %c0_i32, %c0_i32_0 : i32, i32
  }
  func.func @transform_7(%arg0: i32) -> (i32, i32) {
    %c0_i32 = arith.constant 0 : i32
    %c0_i32_0 = arith.constant 0 : i32
    %c0_i32_1 = arith.constant 0 : i32
    return %c0_i32, %c0_i32_0 : i32, i32
  }
  func.func @transform_8(%arg0: i32) -> (i32, i32) {
    %c0_i32 = arith.constant 0 : i32
    %c0_i32_0 = arith.constant 0 : i32
    %c0_i32_1 = arith.constant 0 : i32
    return %c0_i32, %c0_i32_0 : i32, i32
  }
  func.func @transform_9(%arg0: i32) -> (i32, i32) {
    %c0_i32 = arith.constant 0 : i32
    %c0_i32_0 = arith.constant 0 : i32
    %c0_i32_1 = arith.constant 0 : i32
    return %c0_i32, %c0_i32_0 : i32, i32
  }
  func.func @transform_10(%arg0: i32) -> (i32, i32) {
    %c0_i32 = arith.constant 0 : i32
    %c0_i32_0 = arith.constant 0 : i32
    %c0_i32_1 = arith.constant 0 : i32
    return %c0_i32, %c0_i32_0 : i32, i32
  }
  func.func @transform_11(%arg0: i32) -> (i32, i32, i32) {
    %c0_i32 = arith.constant 0 : i32
    %c0_i32_0 = arith.constant 0 : i32
    %c0_i32_1 = arith.constant 0 : i32
    return %arg0, %c0_i32, %c0_i32_0 : i32, i32, i32
  }
}

</mosaic_0001>

<bundles_post_ra>
// kernel: tpu_custom_call.1
= control target key start
LH: loop header
LB: loop body
LE: loop exit
PB: predicated region body
PF: predicated region fallthrough
CT: control target
= control target key end

     0   :  { %vm44_vm0 = vcmask 261120   ;;  %s2199_s0 = inlined_call_operand.vmem [shape: f32[2,8,32], index: 0, kind: input, shape index: {}]   ;;  %s2200_s1 = inlined_call_operand.vmem [shape: f32[1,32], index: 1, kind: input, shape index: {}]   ;;  %s2201_s2 = inlined_call_operand.vmem [shape: f32[1,32], index: 2, kind: input, shape index: {}]   ;;  %s2202_s3 = inlined_call_operand.vmem [shape: bf16[32,96], index: 3, kind: input, shape index: {}]   ;;  %s2203_s4 = inlined_call_operand.vmem [shape: f32[1,96], index: 4, kind: input, shape index: {}]   ;;  %s2204_s5 = inlined_call_operand.vmem [shape: bf16[32,32], index: 5, kind: input, shape index: {}]   ;;  %s2205_s6 = inlined_call_operand.vmem [shape: f32[1,32], index: 6, kind: input, shape index: {}]   ;;  %s2206_s7 = inlined_call_operand.vmem [shape: f32[1,32], index: 7, kind: input, shape index: {}]   ;;  %s2207_s8 = inlined_call_operand.vmem [shape: f32[1,32], index: 8, kind: input, shape index: {}]   ;;  %s2208_s9 = inlined_call_operand.vmem [shape: bf16[32,128], index: 9, kind: input, shape index: {}]   ;;  %s2209_s10 = inlined_call_operand.vmem [shape: bf16[128,32], index: 10, kind: input, shape index: {}]   ;;  %s2210_s11 = inlined_call_operand.hbm [shape: f32[2,8,32], index: 11, kind: output, shape index: {}]  }
   0x1   :  { %v1908_v0 = vld [vmem:[%s2199_s0] sm:$0xff]  ;;  %v1913_v1 = vld [vmem:[%s2199_s0 + $0x8] sm:$0xff] }
   0x2   :  { %v45_v2 = vsel %vm44_vm0, %v1908_v0, 0.0  ;;  %v48_v3 = vsel %vm44_vm0, %v1913_v1, 0.0 }
   0x3   :  { %46 = vadd.xlane.f32.xlu0 %v45_v2 }
   0x7   :  { %49 = vadd.xlane.f32.xlu0 %v48_v3 }
   0x8   :  { %16 = vsyncpa [#allocation3], 0  ;;  %v1755_v14 = vld [vmem:[%s2202_s3 + $0x8] sm:$0xff]   ;;  %v1829_v15 = vmov 0.0   ;;  %vm1830_vm1 = vmmov 0   ;;  %v1756_v16 = vld [vmem:[%s2202_s3] sm:$0xff]  }
   0x9   :  { %1583 = vmatprep.subr.bf16.mxu1 %v1829_v15  ;;  %1587 = vmatprep.mubr.msk.bf16.mxu1 %vm1830_vm1, %v1829_v15  ;;  %v1484_v25 = vld [vmem:[%s2200_s1] ss:$0 sm:$0xff]  ;;  %s1831_s1 = smov 96   ;;  %vm164_vm2 = vcmask 64512   ;;  %vm288_vm3 = vcmask 1043456   ;;  %s1834_s29 = smov 120  }
   0xa   :  { %1584 = vmatpush3.bf16.msra.mxu1 %v1755_v14  ;;  %1609 = vmatprep.subr.bf16.mxu0 %v1829_v15  ;;  %v1485_v29 = vld [vmem:[%s2201_s2] ss:$0 sm:$0xff]  ;;  %s1832_s2 = smov 64   ;;  %s1835_s30 = smov 56  }
   0xb   :  { %1585 = vmatprep.subr.bf16.mxu1 %v1829_v15  ;;  %1611 = vmatprep.mubr.msk.bf16.mxu0 %vm1830_vm1, %v1829_v15  ;;  %v1486_v34 = vld [vmem:[%s2203_s4] ss:$0 sm:$0xff]  ;;  %s1833_s4 = smov 88   ;;  %s1836_s12 = smov 80  }
   0xc   :  { %s1837_s13 = smov 112   ;;  %s1838_s18 = smov 48  }
   0xd   :  { %s1839_s19 = smov 72   ;;  %s1840_s20 = smov 104  }
   0xe   :  { %1586 = vmatpush3.bf16.msra.mxu1 %v1756_v16  ;;  %s1841_s22 = smov 40  }
   0xf   :  { %1591 = vmatprep.subr.bf16.mxu1 %v1829_v15 }
  0x8c   :  { %v47_v4 = vpop.xlane.xlu0 %46 }
  0x8d   :  { %v52_v5 = vmul.f32 0.03125, %v47_v4 }
  0x8f   :  { %v54_v6 = vsub.f32 %v1908_v0, %v52_v5 }
  0x90   :  { %v50_v7 = vpop.xlane.xlu0 %49 }
  0x91   :  { %v53_v8 = vmul.f32 0.03125, %v50_v7  ;;  %v56_v9 = vmul.f32 %v54_v6, %v54_v6 }
  0x93   :  { %v55_v10 = vsub.f32 %v1913_v1, %v53_v8  ;;  %v58_v11 = vsel %vm44_vm0, %v56_v9, 0.0 }
  0x94   :  { %59 = vadd.xlane.f32.xlu1 %v58_v11 }
  0x95   :  { %v57_v12 = vmul.f32 %v55_v10, %v55_v10 }
  0x97   :  { %v61_v13 = vsel %vm44_vm0, %v57_v12, 0.0 }
  0x98   :  { %62 = vadd.xlane.f32.xlu1 %v61_v13 }
 0x11d   :  { %v60_v17 = vpop.xlane.xlu1 %59 }
 0x11e   :  { %v64_v18 = vmul.f32 0.03125, %v60_v17 }
 0x120   :  { %v66_v19 = vadd.f32 1e-05, %v64_v18 }
 0x121   :  { %v63_v20 = vpop.xlane.xlu1 %62 }
 0x122   :  { %1767 = vrsqrt.f32 %v66_v19  ;;  %v65_v21 = vmul.f32 0.03125, %v63_v20 }
 0x124   :  { %v67_v22 = vadd.f32 1e-05, %v65_v21 }
 0x126   :  { %1769 = vrsqrt.f32 %v67_v22 }
 0x12f   :  { %v1768_v23 = vpop.eup %1767 }
 0x130   :  { %v70_v24 = vmul.f32 %v1768_v23, %v54_v6 }
 0x132   :  { %v78_v28 = vmul.f32 %v1484_v25, %v70_v24 }
 0x133   :  { %v1770_v26 = vpop.eup %1769 }
 0x134   :  { %v71_v27 = vmul.f32 %v1770_v26, %v55_v10  ;;  %v86_v31 = vadd.f32 %v1485_v29, %v78_v28 }
 0x136   :  { %v79_v30 = vmul.f32 %v1484_v25, %v71_v27 }
 0x138   :  { %v87_v32 = vadd.f32 %v1485_v29, %v79_v30 }
 0x13a   :  { %v88_v33 = vpack.c.bf16 %v87_v32, %v86_v31 }
 0x13c   :  { %1588 = vmatmul.mubr.msk.bf16.vlgmr.msra.gmra.mxu1 %vm44_vm0, %v88_v33 }
 0x13d   :  { %1593 = vmatprep.mubr.msk.bf16.mxu1 %vm1830_vm1, %v1829_v15 }
 0x1fc   :  { %v149_v35 = vpop.f32.mrf.mxu1 }
 0x1fd   :  { %v150_v36 = vadd.f32 %v1486_v34, %v149_v35 }
 0x1fe   :  { %v1589_v37 = vpop.f32.mrf.mxu1 }
 0x1ff   :  { %v1949_v38 = vpack.c.bf16 %v150_v36, %v150_v36 }
 0x200   :  { %v152_v39 = vpop.f32.mrf.mxu1 }
 0x201   :  { %v153_v40 = vadd.f32 %v1486_v34, %v152_v39  ;;  %162 = vrot.lane.b32.xlu0 %v1949_v38, %s1831_s1 }
 0x202   :  { %v1590_v41 = vpop.f32.mrf.mxu1 }
 0x203   :  { %v1952_v42 = vpack.c.bf16 %v153_v40, %v153_v40 }
 0x205   :  { %211 = vrot.lane.b32.xlu1 %v1952_v42, %s1831_s1 }
 0x273   :  { %v163_v43 = vpop.permute.xlu0 %162 }
 0x274   :  { %v169_v44 = vsel %vm164_vm2, %v163_v43, 0 }
 0x275   :  { %1592 = vmatpush3.bf16.xpose.msra.mxu1 %v169_v44 }
 0x276   :  { %1597 = vmatprep.subr.bf16.mxu1 %v1829_v15 }
 0x277   :  { %v212_v45 = vpop.permute.xlu1 %211 }
 0x278   :  { %v217_v46 = vsel %vm164_vm2, %v212_v45, 0 }
 0x27c   :  { %1594 = vmatmul.mubr.msk.bf16.vlgmr.msra.gmra.mxu1 %vm164_vm2, %v1949_v38 }
 0x27d   :  { %1598 = vmatpush3.bf16.xpose.msra.mxu1 %v217_v46  ;;  %1599 = vmatprep.mubr.msk.bf16.mxu1 %vm1830_vm1, %v1829_v15 }
 0x27e   :  { %1603 = vmatprep.subr.bf16.mxu1 %v1829_v15 }
 0x284   :  { %1600 = vmatmul.mubr.msk.bf16.vlgmr.msra.gmra.mxu1 %vm164_vm2, %v1952_v42 }
 0x285   :  { %1605 = vmatprep.mubr.msk.bf16.mxu1 %vm1830_vm1, %v1829_v15 }
 0x33c   :  { %v205_v47 = vpop.f32.mrf.mxu1 }
 0x33d   :  { %v259_v48 = vsel %vm164_vm2, %v205_v47, -inf }
 0x33e   :  { %260 = vmax.xlane.f32.xlu1 %v259_v48  ;;  %v1595_v49 = vpop.f32.mrf.mxu1 }
 0x340   :  { %v208_v50 = vpop.f32.mrf.mxu1 }
 0x342   :  { %v1596_v51 = vpop.f32.mrf.mxu1 }
 0x344   :  { %v253_v52 = vpop.f32.mrf.mxu1 }
 0x345   :  { %v262_v53 = vsel %vm164_vm2, %v253_v52, -inf }
 0x346   :  { %263 = vmax.xlane.f32.xlu0 %v262_v53  ;;  %v1601_v54 = vpop.f32.mrf.mxu1 }
 0x348   :  { %v256_v55 = vpop.f32.mrf.mxu1 }
 0x34a   :  { %v1602_v56 = vpop.f32.mrf.mxu1 }
 0x34f   :  { %332 = vrot.lane.b32.xlu1 %v1952_v42, %s1832_s2 }
 0x353   :  { %384 = vrot.lane.b32.xlu1 %v1949_v38, %s1833_s4 }
 0x3c7   :  { %v261_v57 = vpop.xlane.xlu1 %260 }
 0x3c8   :  { %v265_v58 = vsub.f32 %v205_v47, %v261_v57 }
 0x3ca   :  { %v267_v59 = vmul.f32 1.442695, %v265_v58 }
 0x3cb   :  { %v333_v60 = vpop.permute.xlu1 %332 }
 0x3cc   :  { %1771 = vpow2.f32 %v267_v59  ;;  %v338_v61 = vsel %vm288_vm3, %v333_v60, 0 }
 0x3cd   :  { %1610 = vmatpush3.bf16.msra.mxu0 %v338_v61 }
 0x3ce   :  { %1621 = vmatprep.subr.bf16.mxu0 %v1829_v15 }
 0x3cf   :  { %v264_v62 = vpop.xlane.xlu0 %263  ;;  %v385_v8 = vpop.permute.xlu1 %384 }
 0x3d0   :  { %v266_v63 = vsub.f32 %v253_v52, %v264_v62  ;;  %v390_v16 = vsel %vm164_vm2, %v385_v8, 0 }
 0x3d2   :  { %v269_v2 = vmul.f32 1.442695, %v266_v63 }
 0x3d4   :  { %1773 = vpow2.f32 %v269_v2 }
 0x3d9   :  { %v1772_v3 = vpop.eup %1771 }
 0x3da   :  { %v271_v4 = vsel %vm164_vm2, %v1772_v3, 0.0 }
 0x3db   :  { %272 = vadd.xlane.f32.xlu0 %v271_v4 }
 0x3e1   :  { %v1774_v5 = vpop.eup %1773 }
 0x3e2   :  { %v274_v6 = vsel %vm164_vm2, %v1774_v5, 0.0 }
 0x3e3   :  { %275 = vadd.xlane.f32.xlu1 %v274_v6 }
 0x3f1   :  { %283 = vrot.lane.b32.xlu0 %v1949_v38, %s1832_s2 }
 0x3f4   :  { %434 = vrot.lane.b32.xlu1 %v1952_v42, %s1833_s4 }
 0x3f5   :  { %382 = vrot.lane.b32.xlu0 %v1949_v38, %s1834_s29 }
 0x3f8   :  { %432 = vrot.lane.b32.xlu1 %v1952_v42, %s1834_s29 }
 0x464   :  { %v273_v7 = vpop.xlane.xlu0 %272 }
 0x465   :  { %1775 = vrcp.f32 %v273_v7 }
 0x468   :  { %v284_v9 = vpop.permute.xlu0 %283 }
 0x469   :  { %v290_v10 = vsel %vm288_vm3, %v284_v9, 0 }
 0x46a   :  { %1604 = vmatpush3.bf16.msra.mxu1 %v290_v10 }
 0x46b   :  { %1615 = vmatprep.subr.bf16.mxu1 %v1829_v15 }
 0x46c   :  { %v276_v11 = vpop.xlane.xlu1 %275  ;;  %v383_v21 = vpop.permute.xlu0 %382 }
 0x46d   :  { %1777 = vrcp.f32 %v276_v11  ;;  %v603_v11 = vld [vmem:[%s2204_s5 + $0x4] sm:$0xf] }
 0x470   :  { %v435_v19 = vpop.permute.xlu1 %434 }
 0x471   :  { %v440_v22 = vsel %vm164_vm2, %v435_v19, 0 }
 0x472   :  { %v1776_v12 = vpop.eup %1775 }
 0x473   :  { %v279_v13 = vmul.f32 %v1776_v12, %v1772_v3  ;;  %v381_v3 = vld [vmem:[%s2204_s5] sm:$0xf]  ;;  %v608_v12 = vsel %vm288_vm3, %v603_v11, 0 }
 0x474   :  { %v433_v23 = vpop.permute.xlu1 %432  ;;  %v655_v6 = vsel %vm288_vm3, %v381_v3, 0 }
 0x475   :  { %v281_v14 = vpack.c.bf16 %v279_v13, %v279_v13 }
 0x477   :  { %1606 = vmatmul.mubr.msk.bf16.vlgmr.msra.gmra.mxu1 %vm164_vm2, %v281_v14 }
 0x478   :  { %1616 = vmatpush3.bf16.xpose.msra.mxu1 %v390_v16  ;;  %1617 = vmatprep.mubr.msk.bf16.mxu1 %vm1830_vm1, %v1829_v15 }
 0x479   :  { %1627 = vmatprep.subr.bf16.mxu1 %v1829_v15 }
 0x47a   :  { %v1778_v17 = vpop.eup %1777 }
 0x47b   :  { %v280_v18 = vmul.f32 %v1778_v17, %v1774_v5 }
 0x47d   :  { %v282_v20 = vpack.c.bf16 %v280_v18, %v280_v18 }
 0x47f   :  { %1612 = vmatmul.mubr.msk.bf16.vlgmr.msra.gmra.mxu0 %vm164_vm2, %v282_v20  ;;  %1618 = vmatmul.mubr.msk.bf16.vlgmr.msra.gmra.mxu1 %vm164_vm2, %v383_v21 }
 0x480   :  { %1622 = vmatpush3.bf16.xpose.msra.mxu0 %v440_v22  ;;  %1623 = vmatprep.mubr.msk.bf16.mxu0 %vm1830_vm1, %v1829_v15 }
 0x481   :  { %1633 = vmatprep.subr.bf16.mxu0 %v1829_v15  ;;  %1629 = vmatprep.mubr.msk.bf16.mxu1 %vm1830_vm1, %v1829_v15 }
 0x487   :  { %1624 = vmatmul.mubr.msk.bf16.vlgmr.msra.gmra.mxu0 %vm164_vm2, %v433_v23 }
 0x488   :  { %1635 = vmatprep.mubr.msk.bf16.mxu0 %vm1830_vm1, %v1829_v15 }
 0x537   :  { %v1997_v24 = vpop.f32.mrf.mxu1 }
 0x539   :  { %v1607_v25 = vpop.f32.mrf.mxu1 }
 0x53b   :  { %v329_v26 = vpop.f32.mrf.mxu1 }
 0x53d   :  { %v1608_v27 = vpop.f32.mrf.mxu1 }
 0x53f   :  { %v1999_v28 = vpop.f32.mrf.mxu0  ;;  %v426_v29 = vpop.f32.mrf.mxu1 }
 0x540   :  { %v380_v30 = vpack.c.bf16 %v1999_v28, %v1997_v24  ;;  %v482_v31 = vsel %vm164_vm2, %v426_v29, -inf }
 0x541   :  { %v1613_v32 = vpop.f32.mrf.mxu0  ;;  %483 = vmax.xlane.f32.xlu0 %v482_v31  ;;  %v1619_v33 = vpop.f32.mrf.mxu1 }
 0x543   :  { %v377_v34 = vpop.f32.mrf.mxu0  ;;  %v429_v35 = vpop.f32.mrf.mxu1 }
 0x545   :  { %v1614_v36 = vpop.f32.mrf.mxu0  ;;  %v1620_v37 = vpop.f32.mrf.mxu1 }
 0x547   :  { %v476_v39 = vpop.f32.mrf.mxu0 }
 0x548   :  { %v485_v40 = vsel %vm164_vm2, %v476_v39, -inf }
 0x549   :  { %486 = vmax.xlane.f32.xlu1 %v485_v40  ;;  %v1625_v41 = vpop.f32.mrf.mxu0 }
 0x54b   :  { %v479_v43 = vpop.f32.mrf.mxu0 }
 0x54d   :  { %v1626_v44 = vpop.f32.mrf.mxu0 }
 0x55a   :  { %554 = vrot.lane.b32.xlu1 %v1952_v42, %s1835_s30 }
 0x55e   :  { %700 = vrot.lane.b32.xlu1 %v1949_v38, %s1836_s12 }
 0x562   :  { %750 = vrot.lane.b32.xlu1 %v1952_v42, %s1836_s12 }
 0x566   :  { %748 = vrot.lane.b32.xlu1 %v1952_v42, %s1837_s13 }
 0x5ca   :  { %v484_v45 = vpop.xlane.xlu0 %483 }
 0x5cb   :  { %v488_v46 = vsub.f32 %v426_v29, %v484_v45 }
 0x5cd   :  { %v490_v47 = vmul.f32 1.442695, %v488_v46 }
 0x5cf   :  { %1779 = vpow2.f32 %v490_v47 }
 0x5d2   :  { %v487_v48 = vpop.xlane.xlu1 %486 }
 0x5d3   :  { %v489_v49 = vsub.f32 %v476_v39, %v487_v48 }
 0x5d5   :  { %v492_v50 = vmul.f32 1.442695, %v489_v49 }
 0x5d6   :  { %v555_v51 = vpop.permute.xlu1 %554 }
 0x5d7   :  { %1781 = vpow2.f32 %v492_v50  ;;  %v560_v52 = vsel %vm288_vm3, %v555_v51, 0 }
 0x5d8   :  { %1634 = vmatpush3.bf16.msra.mxu0 %v560_v52 }
 0x5d9   :  { %1645 = vmatprep.subr.bf16.mxu0 %v1829_v15 }
 0x5da   :  { %v701_v7 = vpop.permute.xlu1 %700 }
 0x5db   :  { %v706_v21 = vsel %vm164_vm2, %v701_v7, 0 }
 0x5dc   :  { %v1780_v53 = vpop.eup %1779 }
 0x5dd   :  { %v494_v54 = vsel %vm164_vm2, %v1780_v53, 0.0 }
 0x5de   :  { %495 = vadd.xlane.f32.xlu0 %v494_v54  ;;  %v751_v8 = vpop.permute.xlu1 %750 }
 0x5df   :  { %v756_v9 = vsel %vm164_vm2, %v751_v8, 0 }
 0x5e2   :  { %v749_v10 = vpop.permute.xlu1 %748 }
 0x5e4   :  { %v1782_v55 = vpop.eup %1781 }
 0x5e5   :  { %v497_v56 = vsel %vm164_vm2, %v1782_v55, 0.0 }
 0x5e6   :  { %498 = vadd.xlane.f32.xlu0 %v497_v56 }
 0x5fc   :  { %506 = vrot.lane.b32.xlu0 %v1949_v38, %s1835_s30 }
 0x600   :  { %698 = vrot.lane.b32.xlu0 %v1949_v38, %s1837_s13 }
 0x667   :  { %v496_v57 = vpop.xlane.xlu0 %495 }
 0x668   :  { %1783 = vrcp.f32 %v496_v57 }
 0x66f   :  { %v499_v58 = vpop.xlane.xlu0 %498 }
 0x670   :  { %1785 = vrcp.f32 %v499_v58 }
 0x673   :  { %v507_v59 = vpop.permute.xlu0 %506 }
 0x674   :  { %v512_v60 = vsel %vm288_vm3, %v507_v59, 0 }
 0x675   :  { %v1784_v61 = vpop.eup %1783  ;;  %1628 = vmatpush3.bf16.msra.mxu1 %v512_v60 }
 0x676   :  { %v502_v62 = vmul.f32 %v1784_v61, %v1780_v53  ;;  %1639 = vmatprep.subr.bf16.mxu1 %v1829_v15 }
 0x677   :  { %v699_v25 = vpop.permute.xlu0 %698 }
 0x678   :  { %v504_v63 = vpack.c.bf16 %v502_v62, %v502_v62 }
 0x67a   :  { %1630 = vmatmul.mubr.msk.bf16.vlgmr.msra.gmra.mxu1 %vm164_vm2, %v504_v63 }
 0x67b   :  { %1641 = vmatprep.mubr.msk.bf16.mxu1 %vm1830_vm1, %v1829_v15  ;;  %1640 = vmatpush3.bf16.msra.mxu1 %v608_v12  ;;  %v919_v12 = vld [vmem:[%s2204_s5 + $0x8] sm:$0xf] }
 0x67c   :  { %1651 = vmatprep.subr.bf16.mxu1 %v1829_v15 }
 0x67d   :  { %v1786_v2 = vpop.eup %1785 }
 0x67e   :  { %v503_v4 = vmul.f32 %v1786_v2, %v1782_v55 }
 0x680   :  { %v505_v5 = vpack.c.bf16 %v503_v4, %v503_v4 }
 0x682   :  { %1636 = vmatmul.mubr.msk.bf16.vlgmr.msra.gmra.mxu0 %vm164_vm2, %v505_v5 }
 0x683   :  { %1646 = vmatpush3.bf16.msra.mxu0 %v655_v6  ;;  %1647 = vmatprep.mubr.msk.bf16.mxu0 %vm1830_vm1, %v1829_v15 }
 0x684   :  { %1657 = vmatprep.subr.bf16.mxu0 %v1829_v15 }
 0x68a   :  { %1648 = vmatmul.mubr.msk.bf16.vlgmr.msra.gmra.mxu0 %vm164_vm2, %v380_v30 }
 0x68b   :  { %1658 = vmatpush3.bf16.xpose.msra.mxu0 %v756_v9  ;;  %1659 = vmatprep.mubr.msk.bf16.mxu0 %vm1830_vm1, %v1829_v15 }
 0x68c   :  { %1669 = vmatprep.subr.bf16.mxu0 %v1829_v15 }
 0x692   :  { %1660 = vmatmul.mubr.msk.bf16.vlgmr.msra.gmra.mxu0 %vm164_vm2, %v749_v10 }
 0x693   :  { %1671 = vmatprep.mubr.msk.bf16.mxu0 %vm1830_vm1, %v1829_v15 }
 0x73a   :  { %v548_v13 = vpop.f32.mrf.mxu1 }
 0x73c   :  { %v1631_v14 = vpop.f32.mrf.mxu1 }
 0x73e   :  { %v551_v16 = vpop.f32.mrf.mxu1 }
 0x740   :  { %v1632_v17 = vpop.f32.mrf.mxu1 }
 0x742   :  { %v596_v18 = vpop.f32.mrf.mxu0 }
 0x743   :  { %v602_v19 = vpack.c.bf16 %v596_v18, %v548_v13  ;;  %v924_v13 = vsel %vm288_vm3, %v919_v12, 0 }
 0x744   :  { %v1637_v20 = vpop.f32.mrf.mxu0 }
 0x745   :  { %1642 = vmatmul.mubr.msk.bf16.vlgmr.msra.gmra.mxu1 %vm164_vm2, %v602_v19 }
 0x746   :  { %1652 = vmatpush3.bf16.xpose.msra.mxu1 %v706_v21  ;;  %v599_v22 = vpop.f32.mrf.mxu0  ;;  %1653 = vmatprep.mubr.msk.bf16.mxu1 %vm1830_vm1, %v1829_v15 }
 0x747   :  { %1663 = vmatprep.subr.bf16.mxu1 %v1829_v15 }
 0x748   :  { %v1638_v23 = vpop.f32.mrf.mxu0 }
 0x74a   :  { %v2049_v24 = vpop.f32.mrf.mxu0 }
 0x74c   :  { %v1649_v26 = vpop.f32.mrf.mxu0 }
 0x74d   :  { %1654 = vmatmul.mubr.msk.bf16.vlgmr.msra.gmra.mxu1 %vm164_vm2, %v699_v25 }
 0x74e   :  { %v2052_v27 = vpop.f32.mrf.mxu0  ;;  %1665 = vmatprep.mubr.msk.bf16.mxu1 %vm1830_vm1, %v1829_v15 }
 0x750   :  { %v1650_v28 = vpop.f32.mrf.mxu0 }
 0x752   :  { %v792_v29 = vpop.f32.mrf.mxu0 }
 0x753   :  { %v801_v30 = vsel %vm164_vm2, %v792_v29, -inf }
 0x754   :  { %802 = vmax.xlane.f32.xlu1 %v801_v30  ;;  %v1661_v31 = vpop.f32.mrf.mxu0 }
 0x756   :  { %v795_v32 = vpop.f32.mrf.mxu0 }
 0x758   :  { %v1662_v33 = vpop.f32.mrf.mxu0 }
 0x765   :  { %870 = vrot.lane.b32.xlu1 %v1952_v42, %s1838_s18 }
 0x769   :  { %971 = vrot.lane.b32.xlu1 %v1949_v38, %s1839_s19 }
 0x76d   :  { %1021 = vrot.lane.b32.xlu1 %v1952_v42, %s1839_s19 }
 0x771   :  { %1019 = vrot.lane.b32.xlu1 %v1952_v42, %s1840_s20 }
 0x7dd   :  { %v803_v34 = vpop.xlane.xlu1 %802 }
 0x7de   :  { %v805_v37 = vsub.f32 %v792_v29, %v803_v34 }
 0x7e0   :  { %v808_v39 = vmul.f32 1.442695, %v805_v37 }
 0x7e1   :  { %v871_v35 = vpop.permute.xlu1 %870 }
 0x7e2   :  { %v876_v36 = vsel %vm288_vm3, %v871_v35, 0  ;;  %1787 = vpow2.f32 %v808_v39 }
 0x7e3   :  { %1670 = vmatpush3.bf16.msra.mxu0 %v876_v36 }
 0x7e4   :  { %1681 = vmatprep.subr.bf16.mxu0 %v1829_v15 }
 0x7e5   :  { %v972_v60 = vpop.permute.xlu1 %971 }
 0x7e6   :  { %v977_v62 = vsel %vm164_vm2, %v972_v60, 0 }
 0x7e9   :  { %v1022_v20 = vpop.permute.xlu1 %1021 }
 0x7ea   :  { %v1027_v25 = vsel %vm164_vm2, %v1022_v20, 0 }
 0x7ed   :  { %v1020_v29 = vpop.permute.xlu1 %1019 }
 0x7ef   :  { %v1788_v47 = vpop.eup %1787 }
 0x7f0   :  { %v813_v50 = vsel %vm164_vm2, %v1788_v47, 0.0 }
 0x805   :  { %v2065_v40 = vpop.f32.mrf.mxu1 }
 0x806   :  { %v692_v35 = vadd.f32 %v2049_v24, %v2065_v40 }
 0x807   :  { %v1643_v41 = vpop.f32.mrf.mxu1 }
 0x809   :  { %v2067_v43 = vpop.f32.mrf.mxu1 }
 0x80a   :  { %v695_v41 = vadd.f32 %v2052_v27, %v2067_v43 }
 0x80b   :  { %v1644_v44 = vpop.f32.mrf.mxu1 }
 0x80d   :  { %v742_v45 = vpop.f32.mrf.mxu1 }
 0x80e   :  { %v798_v46 = vsel %vm164_vm2, %v742_v45, -inf }
 0x80f   :  { %799 = vmax.xlane.f32.xlu0 %v798_v46  ;;  %v1655_v48 = vpop.f32.mrf.mxu1 }
 0x811   :  { %v745_v49 = vpop.f32.mrf.mxu1 }
 0x813   :  { %814 = vadd.xlane.f32.xlu0 %v813_v50  ;;  %v1656_v51 = vpop.f32.mrf.mxu1 }
 0x898   :  { %v800_v52 = vpop.xlane.xlu0 %799 }
 0x899   :  { %v804_v53 = vsub.f32 %v742_v45, %v800_v52 }
 0x89b   :  { %v806_v54 = vmul.f32 1.442695, %v804_v53 }
 0x89c   :  { %v815_v55 = vpop.xlane.xlu0 %814 }
 0x89d   :  { %1789 = vpow2.f32 %v806_v54 }
 0x89e   :  { %1791 = vrcp.f32 %v815_v55 }
 0x8aa   :  { %v1790_v56 = vpop.eup %1789 }
 0x8ab   :  { %v1792_v57 = vpop.eup %1791  ;;  %v810_v58 = vsel %vm164_vm2, %v1790_v56, 0.0 }
 0x8ac   :  { %811 = vadd.xlane.f32.xlu0 %v810_v58  ;;  %v819_v59 = vmul.f32 %v1792_v57, %v1788_v47 }
 0x8ae   :  { %v821_v61 = vpack.c.bf16 %v819_v59, %v819_v59 }
 0x8b0   :  { %1672 = vmatmul.mubr.msk.bf16.vlgmr.msra.gmra.mxu0 %vm164_vm2, %v821_v61 }
 0x8b1   :  { %1682 = vmatpush3.bf16.xpose.msra.mxu0 %v977_v62  ;;  %1683 = vmatprep.mubr.msk.bf16.mxu0 %vm1830_vm1, %v1829_v15 }
 0x8b2   :  { %1693 = vmatprep.subr.bf16.mxu0 %v1829_v15 }
 0x8c2   :  { %822 = vrot.lane.b32.xlu0 %v1949_v38, %s1838_s18 }
 0x8c6   :  { %969 = vrot.lane.b32.xlu0 %v1949_v38, %s1840_s20 }
 0x935   :  { %v812_v63 = vpop.xlane.xlu0 %811 }
 0x936   :  { %1793 = vrcp.f32 %v812_v63  ;;  %v1190_v63 = vld [vmem:[%s2204_s5 + $0xc] sm:$0xf] }
 0x939   :  { %v823_v2 = vpop.permute.xlu0 %822 }
 0x93a   :  { %v828_v3 = vsel %vm288_vm3, %v823_v2, 0  ;;  %v1195_v2 = vsel %vm288_vm3, %v1190_v63, 0 }
 0x93b   :  { %1664 = vmatpush3.bf16.msra.mxu1 %v828_v3 }
 0x93c   :  { %1675 = vmatprep.subr.bf16.mxu1 %v1829_v15 }
 0x93d   :  { %v970_v4 = vpop.permute.xlu0 %969 }
 0x93e   :  { %1684 = vmatmul.mubr.msk.bf16.vlgmr.msra.gmra.mxu0 %vm164_vm2, %v970_v4 }
 0x93f   :  { %1695 = vmatprep.mubr.msk.bf16.mxu0 %vm1830_vm1, %v1829_v15 }
 0x943   :  { %v1794_v5 = vpop.eup %1793 }
 0x944   :  { %v818_v6 = vmul.f32 %v1794_v5, %v1790_v56 }
 0x946   :  { %v820_v7 = vpack.c.bf16 %v818_v6, %v818_v6 }
 0x948   :  { %1666 = vmatmul.mubr.msk.bf16.vlgmr.msra.gmra.mxu1 %vm164_vm2, %v820_v7 }
 0x949   :  { %1677 = vmatprep.mubr.msk.bf16.mxu1 %vm1830_vm1, %v1829_v15  ;;  %1676 = vmatpush3.bf16.msra.mxu1 %v924_v13 }
 0x94a   :  { %1687 = vmatprep.subr.bf16.mxu1 %v1829_v15 }
 0x970   :  { %v912_v8 = vpop.f32.mrf.mxu0 }
 0x972   :  { %v1673_v9 = vpop.f32.mrf.mxu0 }
 0x974   :  { %v915_v10 = vpop.f32.mrf.mxu0 }
 0x976   :  { %v1674_v11 = vpop.f32.mrf.mxu0 }
 0x9fe   :  { %v1013_v14 = vpop.f32.mrf.mxu0 }
 0x9ff   :  { %v1069_v16 = vsel %vm164_vm2, %v1013_v14, -inf }
 0xa00   :  { %1070 = vmax.xlane.f32.xlu0 %v1069_v16  ;;  %v1685_v17 = vpop.f32.mrf.mxu0 }
 0xa02   :  { %v1016_v18 = vpop.f32.mrf.mxu0 }
 0xa04   :  { %v1686_v19 = vpop.f32.mrf.mxu0 }
 0xa08   :  { %v864_v21 = vpop.f32.mrf.mxu1 }
 0xa09   :  { %v918_v22 = vpack.c.bf16 %v912_v8, %v864_v21 }
 0xa0a   :  { %v1667_v23 = vpop.f32.mrf.mxu1 }
 0xa0b   :  { %1678 = vmatmul.mubr.msk.bf16.vlgmr.msra.gmra.mxu1 %vm164_vm2, %v918_v22 }
 0xa0c   :  { %1688 = vmatpush3.bf16.xpose.msra.mxu1 %v1027_v25  ;;  %v867_v26 = vpop.f32.mrf.mxu1  ;;  %1689 = vmatprep.mubr.msk.bf16.mxu1 %vm1830_vm1, %v1829_v15 }
 0xa0d   :  { %1699 = vmatprep.subr.bf16.mxu1 %v1829_v15 }
 0xa0e   :  { %v1668_v28 = vpop.f32.mrf.mxu1 }
 0xa13   :  { %1690 = vmatmul.mubr.msk.bf16.vlgmr.msra.gmra.mxu1 %vm164_vm2, %v1020_v29 }
 0xa14   :  { %1701 = vmatprep.mubr.msk.bf16.mxu1 %vm1830_vm1, %v1829_v15 }
 0xa89   :  { %v1071_v30 = vpop.xlane.xlu0 %1070 }
 0xa8a   :  { %v1075_v31 = vsub.f32 %v1013_v14, %v1071_v30  ;;  %v1512_v14 = vld [vmem:[%s2205_s6] ss:$0 sm:$0xff] }
 0xa8c   :  { %v1077_v32 = vmul.f32 1.442695, %v1075_v31 }
 0xa8e   :  { %1795 = vpow2.f32 %v1077_v32 }
 0xa9b   :  { %v1796_v33 = vpop.eup %1795 }
 0xa9c   :  { %v1081_v34 = vsel %vm164_vm2, %v1796_v33, 0.0 }
 0xa9d   :  { %1082 = vadd.xlane.f32.xlu0 %v1081_v34 }
 0xacb   :  { %v960_v36 = vpop.f32.mrf.mxu1 }
 0xacc   :  { %v967_v37 = vadd.f32 %v960_v36, %v692_v35  ;;  %v1757_v36 = vld [vmem:[%s2208_s9 + $0x8] sm:$0xff]  }
 0xacd   :  { %v1679_v39 = vpop.f32.mrf.mxu1 }
 0xace   :  { %v1759_v39 = vld [vmem:[%s2209_s10 + $0x38] sm:$0xff]  }
 0xacf   :  { %v963_v44 = vpop.f32.mrf.mxu1 }
 0xad0   :  { %v968_v45 = vadd.f32 %v963_v44, %v695_v41  ;;  %v1760_v41 = vld [vmem:[%s2209_s10 + $0x30] sm:$0xff]   ;;  %v1761_v44 = vld [vmem:[%s2209_s10 + $0x28] sm:$0xff]  }
 0xad1   :  { %v1680_v46 = vpop.f32.mrf.mxu1 }
 0xad2   :  { %v1763_v46 = vld [vmem:[%s2209_s10 + $0x18] sm:$0xff]  }
 0xad3   :  { %v1063_v47 = vpop.f32.mrf.mxu1 }
 0xad4   :  { %v1072_v48 = vsel %vm164_vm2, %v1063_v47, -inf }
 0xad5   :  { %1073 = vmax.xlane.f32.xlu1 %v1072_v48  ;;  %v1691_v49 = vpop.f32.mrf.mxu1 }
 0xad7   :  { %v1066_v50 = vpop.f32.mrf.mxu1 }
 0xad9   :  { %v1692_v51 = vpop.f32.mrf.mxu1 }
 0xae6   :  { %1141 = vrot.lane.b32.xlu1 %v1952_v42, %s1841_s22 }
 0xb26   :  { %v1083_v55 = vpop.xlane.xlu0 %1082 }
 0xb5e   :  { %v1074_v24 = vpop.xlane.xlu1 %1073 }
 0xb5f   :  { %v1076_v40 = vsub.f32 %v1063_v47, %v1074_v24  ;;  %v1764_v47 = vld [vmem:[%s2209_s10 + $0x10] sm:$0xff]  }
 0xb61   :  { %v1079_v52 = vmul.f32 1.442695, %v1076_v40 }
 0xb62   :  { %v1142_v53 = vpop.permute.xlu1 %1141 }
 0xb63   :  { %1797 = vpow2.f32 %v1079_v52  ;;  %v1147_v27 = vsel %vm288_vm3, %v1142_v53, 0 }
 0xb64   :  { %1700 = vmatpush3.bf16.msra.mxu1 %v1147_v27  ;;  %1799 = vrcp.f32 %v1083_v55  ;;  %v1513_v27 = vld [vmem:[%s2206_s7] ss:$0 sm:$0xff] }
 0xb65   :  { %1711 = vmatprep.subr.bf16.mxu1 %v1829_v15 }
 0xb70   :  { %v1798_v43 = vpop.eup %1797 }
 0xb71   :  { %v1084_v54 = vsel %vm164_vm2, %v1798_v43, 0.0  ;;  %v1800_v56 = vpop.eup %1799 }
 0xb72   :  { %1085 = vadd.xlane.f32.xlu0 %v1084_v54  ;;  %v1089_v57 = vmul.f32 %v1800_v56, %v1796_v33  ;;  %v1514_v56 = vld [vmem:[%s2207_s8] ss:$0 sm:$0xff]  ;;  %s1842_s8 = smov [#allocation2]  }
 0xb73   :  { %s1473_s23 = sshll.u32 %s1842_s8, 4  ;;  %s1474_s23 = int_to_ptr.vmem [resolvable:$true] %s1473_s23 }
 0xb74   :  { %v1091_v60 = vpack.c.bf16 %v1089_v57, %v1089_v57  ;;  %p1812_p1 = scmp.lt.s32.totalorder %s1474_s23, %s1474_s23 }
 0xb88   :  { %1093 = vrot.lane.b32.xlu0 %v1949_v38, %s1841_s22 }
 0xbfb   :  { %v1086_v42 = vpop.xlane.xlu0 %1085 }
 0xbfc   :  { %1801 = vrcp.f32 %v1086_v42 }
 0xbff   :  { %v1094_v58 = vpop.permute.xlu0 %1093 }
 0xc00   :  { %v1099_v59 = vsel %vm288_vm3, %v1094_v58, 0 }
 0xc01   :  { %1694 = vmatpush3.bf16.msra.mxu0 %v1099_v59 }
 0xc02   :  { %1705 = vmatprep.subr.bf16.mxu0 %v1829_v15 }
 0xc04   :  { %1696 = vmatmul.mubr.msk.bf16.vlgmr.msra.gmra.mxu0 %vm164_vm2, %v1091_v60  ;;  %v1765_v60 = vld [vmem:[%s2209_s10 + $0x8] sm:$0xff]  }
 0xc05   :  { %1707 = vmatprep.mubr.msk.bf16.mxu0 %vm1830_vm1, %v1829_v15  ;;  %1706 = vmatpush3.bf16.msra.mxu0 %v1195_v2 }
 0xc06   :  { %1719 = vmatprep.subr.bf16.mxu0 %v1829_v15 }
 0xc09   :  { %v1802_v61 = vpop.eup %1801 }
 0xc0a   :  { %v1090_v38 = vmul.f32 %v1802_v61, %v1798_v43  ;;  %v1766_v61 = vld [vmem:[%s2209_s10] sm:$0xff]  }
 0xc0c   :  { %v1092_v62 = vpack.c.bf16 %v1090_v38, %v1090_v38 }
 0xc0e   :  { %1702 = vmatmul.mubr.msk.bf16.vlgmr.msra.gmra.mxu1 %vm164_vm2, %v1092_v62 }
 0xc0f   :  { %1715 = vmatprep.mubr.msk.bf16.mxu1 %vm1830_vm1, %v1829_v15  ;;  %1712 = vmatpush3.bf16.msra.mxu1 %v1757_v36 }
 0xc10   :  { %1713 = vmatprep.subr.bf16.mxu1 %v1829_v15 }
 0xcc4   :  { %v1135_v3 = vpop.f32.mrf.mxu0 }
 0xcc6   :  { %v1697_v4 = vpop.f32.mrf.mxu0 }
 0xcc8   :  { %v1138_v5 = vpop.f32.mrf.mxu0 }
 0xcca   :  { %v1698_v6 = vpop.f32.mrf.mxu0 }
 0xcce   :  { %v1183_v7 = vpop.f32.mrf.mxu1 }
 0xccf   :  { %v1189_v8 = vpack.c.bf16 %v1183_v7, %v1135_v3 }
 0xcd0   :  { %v1703_v9 = vpop.f32.mrf.mxu1 }
 0xcd1   :  { %1708 = vmatmul.mubr.msk.bf16.vlgmr.msra.gmra.mxu0 %vm164_vm2, %v1189_v8 }
 0xcd2   :  { %v1186_v10 = vpop.f32.mrf.mxu1  ;;  %1735 = vmatprep.mubr.msk.bf16.mxu0 %vm1830_vm1, %v1829_v15  ;;  %1720 = vmatpush3.bf16.msra.mxu0 %v1759_v39 }
 0xcd3   :  { %1721 = vmatprep.subr.bf16.mxu0 %v1829_v15 }
 0xcd4   :  { %v1704_v11 = vpop.f32.mrf.mxu1 }
 0xcd6   :  { %1722 = vmatpush3.bf16.msra.mxu0 %v1760_v41 }
 0xcd7   :  { %1723 = vmatprep.subr.bf16.mxu0 %v1829_v15 }
 0xcda   :  { %1724 = vmatpush3.bf16.msra.mxu0 %v1761_v44 }
 0xcdb   :  { %1725 = vmatprep.subr.bf16.mxu0 %v1829_v15 }
 0xd91   :  { %v1231_v12 = vpop.f32.mrf.mxu0 }
 0xd92   :  { %v1238_v13 = vadd.f32 %v1231_v12, %v967_v37  ;;  %v1758_v37 = vld [vmem:[%s2208_s9] sm:$0xff]  }
 0xd93   :  { %v1709_v16 = vpop.f32.mrf.mxu0  ;;  %1714 = vmatpush3.bf16.msra.mxu1 %v1758_v37 }
 0xd94   :  { %v1240_v17 = vadd.f32 %v1238_v13, %v1908_v0 }
 0xd95   :  { %v1234_v18 = vpop.f32.mrf.mxu0 }
 0xd96   :  { %v2134_v19 = vadd.f32 %v1512_v14, %v1240_v17  ;;  %v1239_v20 = vadd.f32 %v1234_v18, %v968_v45  ;;  %v1762_v45 = vld [vmem:[%s2209_s10 + $0x20] sm:$0xff]   ;;  %s1807_s10 = scalar_lea.vmem %s1474_s23, 256 }
 0xd97   :  { %v1710_v21 = vpop.f32.mrf.mxu0  ;;  %1726 = vmatpush3.bf16.msra.mxu0 %v1762_v45  ;;  %p1808_p0 = scmp.ne.s32.totalorder %s1474_s23, %s1807_s10  ;;  %p1813_p2 = scmp.lt.s32.totalorder %s1807_s10, %s1807_s10 }
 0xd98   :  { %v1241_v22 = vadd.f32 %v1239_v20, %v1913_v1  ;;  %v1253_v23 = vsel %vm44_vm0, %v2134_v19, 0.0  ;;  %1727 = vmatprep.subr.bf16.mxu0 %v1829_v15 }
 0xd99   :  { %1254 = vadd.xlane.f32.xlu1 %v1253_v23  ;;  %p1814_p3 = por %p1813_p2, %p1812_p1 }
 0xd9a   :  { %v2139_v25 = vadd.f32 %v1512_v14, %v1241_v22 }
 0xd9b   :  { %1728 = vmatpush3.bf16.msra.mxu0 %v1763_v46  ;;  %p1815_p4 = pnand %p1814_p3, %p1808_p0 }
 0xd9c   :  { %v1256_v26 = vsel %vm44_vm0, %v2139_v25, 0.0  ;;  %1729 = vmatprep.subr.bf16.mxu0 %v1829_v15 }
 0xd9d   :  { %1257 = vadd.xlane.f32.xlu0 %v1256_v26 }
 0xd9f   :  { %1730 = vmatpush3.bf16.msra.mxu0 %v1764_v47 }
 0xda0   :  { %1731 = vmatprep.subr.bf16.mxu0 %v1829_v15 }
 0xda3   :  { %1732 = vmatpush3.bf16.msra.mxu0 %v1765_v60 }
 0xda4   :  { %1733 = vmatprep.subr.bf16.mxu0 %v1829_v15 }
 0xda7   :  { %1734 = vmatpush3.bf16.msra.mxu0 %v1766_v61 }
 0xe22   :  { %v1255_v28 = vpop.xlane.xlu1 %1254 }
 0xe23   :  { %v1259_v29 = vmul.f32 0.03125, %v1255_v28 }
 0xe25   :  { %v1261_v0 = vsub.f32 %v2134_v19, %v1259_v29 }
 0xe26   :  { %v1258_v30 = vpop.xlane.xlu0 %1257 }
 0xe27   :  { %v1260_v31 = vmul.f32 0.03125, %v1258_v30  ;;  %v1263_v32 = vmul.f32 %v1261_v0, %v1261_v0 }
 0xe29   :  { %v1262_v33 = vsub.f32 %v2139_v25, %v1260_v31  ;;  %v1265_v1 = vsel %vm44_vm0, %v1263_v32, 0.0 }
 0xe2a   :  { %1266 = vadd.xlane.f32.xlu0 %v1265_v1 }
 0xe2b   :  { %v1264_v34 = vmul.f32 %v1262_v33, %v1262_v33 }
 0xe2d   :  { %v1268_v35 = vsel %vm44_vm0, %v1264_v34, 0.0 }
 0xe2e   :  { %1269 = vadd.xlane.f32.xlu1 %v1268_v35 }
 0xeb3   :  { %v1267_v48 = vpop.xlane.xlu0 %1266 }
 0xeb4   :  { %v1271_v49 = vmul.f32 0.03125, %v1267_v48 }
 0xeb6   :  { %v1273_v50 = vadd.f32 1e-05, %v1271_v49 }
 0xeb7   :  { %v1270_v51 = vpop.xlane.xlu1 %1269 }
 0xeb8   :  { %1803 = vrsqrt.f32 %v1273_v50  ;;  %v1272_v24 = vmul.f32 0.03125, %v1270_v51 }
 0xeba   :  { %v1274_v40 = vadd.f32 1e-05, %v1272_v24 }
 0xebc   :  { %1805 = vrsqrt.f32 %v1274_v40 }
 0xec5   :  { %v1804_v52 = vpop.eup %1803 }
 0xec6   :  { %v1277_v53 = vmul.f32 %v1804_v52, %v1261_v0 }
 0xec8   :  { %v1285_v55 = vmul.f32 %v1513_v27, %v1277_v53 }
 0xec9   :  { %v1806_v43 = vpop.eup %1805 }
 0xeca   :  { %v1278_v54 = vmul.f32 %v1806_v43, %v1262_v33  ;;  %v1293_v57 = vadd.f32 %v1514_v56, %v1285_v55 }
 0xecc   :  { %v1286_v42 = vmul.f32 %v1513_v27, %v1278_v54 }
 0xece   :  { %v1294_v58 = vadd.f32 %v1514_v56, %v1286_v42 }
 0xed0   :  { %v1295_v59 = vpack.c.bf16 %v1294_v58, %v1293_v57 }
 0xed2   :  { %1716 = vmatmul.mubr.msk.bf16.vlgmr.msra.gmra.mxu1 %vm44_vm0, %v1295_v59 }
 0xf92   :  { %v1349_v38 = vpop.f32.mrf.mxu1 }
 0xf93   :  { %v1356_v2 = vmax.f32 %v1349_v38, 0.0 }
 0xf94   :  { %v1717_v62 = vpop.f32.mrf.mxu1 }
 0xf96   :  { %v1352_v63 = vpop.f32.mrf.mxu1 }
 0xf97   :  { %v1357_v3 = vmax.f32 %v1352_v63, 0.0 }
 0xf98   :  { %v1718_v4 = vpop.f32.mrf.mxu1 }
 0xf99   :  { %v1358_v5 = vpack.c.bf16 %v1357_v3, %v1356_v2 }
 0xf9b   :  { %1736 = vmatmul.mubr.bf16.vlgmr.msra.gmra.mxu0 %v1358_v5 }
0x105b   :  { %v1457_v6 = vpop.f32.mrf.mxu0 }
0x105c   :  { %v1464_v7 = vadd.f32 %v1457_v6, %v2134_v19 }
0x105d   :  { %v1737_v8 = vpop.f32.mrf.mxu0 }
0x105e   :  { %1466 = vst.msk [vmem:[#allocation2] sm:$0xff] %vm44_vm0, %v1464_v7 }
0x105f   :  { %v1460_v15 = vpop.f32.mrf.mxu0 }
0x1060   :  { %v1465_v9 = vadd.f32 %v1460_v15, %v2139_v25 }
0x1061   :  { %v1738_v10 = vpop.f32.mrf.mxu0 }
0x1062   :  { %1467 = vst.msk [vmem:[#allocation2 + $0x8] sm:$0xff] %vm44_vm0, %v1465_v9 }
0x1063   :  { %1818 = shalt.err (!%p1815_p4)
}
0x1064   :  { %s1843_s3 = smov 128   ;;  %s1844_s5 = smov 8  }
0x1065   :  { %1479 = dma.vmem_to_hbm [thread:$0]  %s1474_s23, 256, %s2210_s11, [#allocation3], %s1843_s3, %s1843_s3, %s1844_s5  }
0x1066   :  { %1827 = dma.done.wait [#allocation3], 256  }
0x1067   :  { %1828 = vsyncadd [#allocation3], 4294967040 }
0x1068   :  { %1483 = vsyncpa [#allocation3], 1 }

</bundles_post_ra>
